<compile_context>
chip_gen: v7x
topology: tpu7x:2x2x1
jax: 0.10.0
libtpu: 0.0.40
codegen_flags: <defaults>
</compile_context>

<pallas_src>
import functools
import math

import jax
import jax.numpy as jnp
from jax.experimental import pallas as pl
from jax.experimental.pallas import tpu as pltpu

LANE = 128
SUBLANE = 8


def _round_up(x, m):
    return (x + m - 1) // m * m


def _pick_batch_tile(batch, block_b):
    # Batch sits on the lane axis: the tile must be a multiple of 128 or equal
    # the full batch.  When the batch is large, use ~ceil(B/2) (capped at
    # block_b) so the grid has >= 2 steps for the v7x megacore split.
    if batch <= LANE:
        return batch
    return min(block_b, _round_up(pl.cdiv(batch, 2), LANE))


def _mlp_kernel(xt_ref, w1_ref, b1_ref, w2_ref, b2_ref, out_ref, *, vpu_fc1):
    # xt_ref:  (input_dim, TB)   x transposed: features on sublanes, batch on lanes
    # w1_ref:  (units, input_dim)             -- resident across the grid
    # b1_ref:  (units, 1)                     -- f32
    # w2_ref:  (nc_pad, units)                -- rows zero-padded to a sublane multiple
    # b2_ref:  (nc_pad, 1)                    -- f32, zero-padded
    # out_ref: (nc_pad, TB)                   -- transposed output tile
    xt = xt_ref[...]
    b1 = b1_ref[...]

    if vpu_fc1:
        # Tiny contraction dim: fc1 as a few outer-product FMAs on the VPU.
        # An MXU matmul here would pad K up to the systolic depth (>98% zeros).
        # xt[k:k+1, :] broadcasts over sublanes (stride-0, cheap); the weight
        # column is a small constant lane-broadcast.
        units = w1_ref.shape[0]
        tb = xt.shape[1]
        h = jnp.broadcast_to(b1, (units, tb))
        for k in range(xt.shape[0]):  # static, small (input_dim <= 16)
            h = h + (w1_ref[:, k:k + 1].astype(jnp.float32)
                     * xt[k:k + 1, :].astype(jnp.float32))
    else:
        h = jnp.dot(w1_ref[...], xt, preferred_element_type=jnp.float32) + b1

    h = jnp.maximum(h, 0.0)  # ReLU on the f32 accumulator

    out = jnp.dot(w2_ref[...], h.astype(w2_ref.dtype),
                  preferred_element_type=jnp.float32) + b2_ref[...]
    out_ref[...] = out.astype(out_ref.dtype)


def prepare_params(w1, b1, w2, b2, *, matmul_dtype=jnp.float32):
    """One-time parameter prep (NOT per forward call).

    Keeps weights in their natural (out_features, in_features) layout and
    sublane-pads the fc2 output rows (num_classes -> multiple of 8) so kernel
    stores stay dense.  For large layers pass matmul_dtype=jnp.bfloat16
    (f32 accumulation is kept in-kernel).
    """
    units, input_dim = w1.shape
    num_classes = w2.shape[0]
    nc_pad = _round_up(num_classes, SUBLANE)

    w1p = w1.astype(matmul_dtype)                                    # (units, input_dim)
    b1c = b1.reshape(units, 1).astype(jnp.float32)                   # (units, 1)
    w2p = jnp.pad(w2, ((0, nc_pad - num_classes), (0, 0))).astype(matmul_dtype)  # (nc_pad, units)
    b2c = jnp.pad(b2.reshape(num_classes, 1).astype(jnp.float32),
                  ((0, nc_pad - num_classes), (0, 0)))               # (nc_pad, 1)
    return w1p, b1c, w2p, b2c


def classifier_forward(x, w1p, b1c, w2p, b2c, *, num_classes,
                       block_b=2048, out_dtype=jnp.float32):
    """Forward pass equivalent to the PyTorch Classifier.forward.

    x: (B, input_dim) f32.  Weight args come from `prepare_params`.
    Returns (B, num_classes) f32.
    """
    B, input_dim = x.shape
    units = w1p.shape[0]
    nc_pad = w2p.shape[0]

    # Tiny contraction dim -> do fc1 on the VPU (kept f32; v5e has no bf16 VALU).
    vpu_fc1 = input_dim <= 16

    # Batch tile on the lane axis; no padding of B to a tile multiple — the
    # trailing partial block is masked by Pallas.
    tb = _pick_batch_tile(B, block_b)
    grid = (pl.cdiv(B, tb),)

    # Feature-major x: (input_dim, B).  This is a tiny copy (input_dim*4 B/row)
    # compared to the padded-output traffic it removes.
    xt = x.T.astype(jnp.float32 if vpu_fc1 else w1p.dtype)

    # VMEM estimate: double-buffer only the streamed x/out tiles; the weights
    # and biases are resident (constant index_map) and counted once.
    itemsz = lambda a: jnp.dtype(a.dtype).itemsize
    weights_bytes = (w1p.size * itemsz(w1p) + b1c.size * itemsz(b1c)
                     + w2p.size * itemsz(w2p) + b2c.size * itemsz(b2c))
    io_tile_bytes = (tb * input_dim * itemsz(xt)
                     + tb * nc_pad * jnp.dtype(out_dtype).itemsize)
    h_bytes = units * tb * 4                      # fc1 activation, f32
    need = 2 * io_tile_bytes + weights_bytes + h_bytes + (2 << 20)
    try:
        vmem_cap = int(pltpu.get_tpu_info().vmem_capacity_bytes)
    except Exception:
        vmem_cap = 64 << 20                       # v7x per-core budget; safe everywhere
    vmem_limit = int(min(max(need, 16 << 20), (vmem_cap * 85) // 100))

    out_t = pl.pallas_call(
        functools.partial(_mlp_kernel, vpu_fc1=vpu_fc1),
        out_shape=jax.ShapeDtypeStruct((nc_pad, B), out_dtype),
        grid=grid,
        in_specs=[
            pl.BlockSpec((input_dim, tb), lambda i: (0, i)),   # x.T: tiled over batch (lanes)
            pl.BlockSpec((units, input_dim), lambda i: (0, 0)),  # W1: resident
            pl.BlockSpec((units, 1), lambda i: (0, 0)),          # b1
            pl.BlockSpec((nc_pad, units), lambda i: (0, 0)),     # W2 (row-padded): resident
            pl.BlockSpec((nc_pad, 1), lambda i: (0, 0)),         # b2 (row-padded)
        ],
        out_specs=pl.BlockSpec((nc_pad, tb), lambda i: (0, i)),
        compiler_params=pltpu.CompilerParams(
            dimension_semantics=("parallel",),   # megacore batch split on v7x
            vmem_limit_bytes=vmem_limit,
        ),
    )(xt, w1p, b1c, w2p, b2c)

    # (nc_pad, B) -> (B, num_classes).  The padded class rows (zero weights /
    # zero bias) are dropped here; keep this slice if the transposed output is
    # ever consumed downstream.
    return out_t[:num_classes, :].T.astype(jnp.float32)


def classifier_forward_ref(x, w1, b1, w2, b2):
    # Pure-JAX reference (semantics of the PyTorch module).
    h = jnp.maximum(x @ w1.T + b1, 0.0)
    return h @ w2.T + b2


if __name__ == "__main__":
    input_dim, units, num_classes = 2, 64, 10
    batch = 8

    key = jax.random.PRNGKey(0)
    kx, k1, kb1, k2, kb2 = jax.random.split(key, 5)

    x = jax.random.normal(kx, (batch, input_dim), dtype=jnp.float32)

    # Deterministic synthetic parameters (PyTorch-uniform-like init ranges).
    bound1 = 1.0 / math.sqrt(input_dim)
    w1 = jax.random.uniform(k1, (units, input_dim), jnp.float32, -bound1, bound1)
    b1 = jax.random.uniform(kb1, (units,), jnp.float32, -bound1, bound1)
    bound2 = 1.0 / math.sqrt(units)
    w2 = jax.random.uniform(k2, (num_classes, units), jnp.float32, -bound2, bound2)
    b2 = jax.random.uniform(kb2, (num_classes,), jnp.float32, -bound2, bound2)

    # One-time parameter prep (row-pad fc2, reshape biases), hoisted out of the
    # per-call forward path.
    params = prepare_params(w1, b1, w2, b2)

    fwd = jax.jit(functools.partial(classifier_forward, num_classes=num_classes))
    out = jax.block_until_ready(fwd(x, *params))

    ref = classifier_forward_ref(x, w1, b1, w2, b2)
    assert out.shape == (batch, num_classes)
    assert jnp.allclose(out, ref, atol=1e-5, rtol=1e-5)

    print("KERNEL_OK")
</pallas_src>

<mosaic_0001>
module attributes {stable_mosaic.version = 11 : i64} {
  func.func @_mlp_kernel(%arg0: i32, %arg1: memref<2x8xf32, #tpu.memory_space<vmem>>, %arg2: memref<64x2xf32, #tpu.memory_space<vmem>>, %arg3: memref<64x1xf32, #tpu.memory_space<vmem>>, %arg4: memref<16x64xf32, #tpu.memory_space<vmem>>, %arg5: memref<16x1xf32, #tpu.memory_space<vmem>>, %arg6: memref<16x8xf32, #tpu.memory_space<vmem>>) attributes {dimension_semantics = [#tpu.dimension_semantics<parallel>], iteration_bounds = array<i64: 1>, scalar_prefetch = 0 : i64, scratch_operands = 0 : i64, tpu.core_type = #tpu.core_type<tc>, window_params = [{transform_indices = @transform_0, window_bounds = array<i64: 2, 8>}, {pipeline_mode = #tpu.pipeline_mode<synchronous>, transform_indices = @transform_1, window_bounds = array<i64: 64, 2>}, {pipeline_mode = #tpu.pipeline_mode<synchronous>, transform_indices = @transform_2, window_bounds = array<i64: 64, 1>}, {pipeline_mode = #tpu.pipeline_mode<synchronous>, transform_indices = @transform_3, window_bounds = array<i64: 16, 64>}, {pipeline_mode = #tpu.pipeline_mode<synchronous>, transform_indices = @transform_4, window_bounds = array<i64: 16, 1>}, {transform_indices = @transform_5, window_bounds = array<i64: 16, 8>}]} {
    %c0 = arith.constant 0 : index
    %c0_0 = arith.constant 0 : index
    %0 = vector.load %arg1[%c0, %c0_0] : memref<2x8xf32, #tpu.memory_space<vmem>>, vector<2x8xf32>
    %c0_1 = arith.constant 0 : index
    %c0_2 = arith.constant 0 : index
    %1 = vector.load %arg3[%c0_1, %c0_2] : memref<64x1xf32, #tpu.memory_space<vmem>>, vector<64x1xf32>
    %2 = vector.shape_cast %1 : vector<64x1xf32> to vector<64x1xf32>
    %3 = vector.broadcast %2 : vector<64x1xf32> to vector<64x8xf32>
    %c0_3 = arith.constant 0 : index
    %c0_4 = arith.constant 0 : index
    %4 = vector.load %arg2[%c0_3, %c0_4] : memref<64x2xf32, #tpu.memory_space<vmem>>, vector<64x1xf32>
    %5 = vector.extract_strided_slice %0 {offsets = [0, 0], sizes = [1, 8], strides = [1, 1]} : vector<2x8xf32> to vector<1x8xf32>
    %6 = vector.broadcast %4 : vector<64x1xf32> to vector<64x8xf32>
    %7 = vector.broadcast %5 : vector<1x8xf32> to vector<64x8xf32>
    %8 = arith.mulf %6, %7 : vector<64x8xf32>
    %9 = arith.addf %3, %8 : vector<64x8xf32>
    %c0_5 = arith.constant 0 : index
    %c1 = arith.constant 1 : index
    %10 = vector.load %arg2[%c0_5, %c1] : memref<64x2xf32, #tpu.memory_space<vmem>>, vector<64x1xf32>
    %11 = vector.extract_strided_slice %0 {offsets = [1, 0], sizes = [1, 8], strides = [1, 1]} : vector<2x8xf32> to vector<1x8xf32>
    %12 = vector.broadcast %10 : vector<64x1xf32> to vector<64x8xf32>
    %13 = vector.broadcast %11 : vector<1x8xf32> to vector<64x8xf32>
    %14 = arith.mulf %12, %13 : vector<64x8xf32>
    %15 = arith.addf %9, %14 : vector<64x8xf32>
    %cst = arith.constant 0.000000e+00 : f32
    %16 = vector.broadcast %cst : f32 to vector<64x8xf32>
    %17 = arith.maximumf %15, %16 : vector<64x8xf32>
    %c0_6 = arith.constant 0 : index
    %c0_7 = arith.constant 0 : index
    %18 = vector.load %arg4[%c0_6, %c0_7] : memref<16x64xf32, #tpu.memory_space<vmem>>, vector<16x64xf32>
    %cst_8 = arith.constant dense<0.000000e+00> : vector<16x8xf32>
    %19 = tpu.matmul %18, %17, %cst_8 {dimension_numbers = #tpu.dot_dimension_numbers<[1], [0], [0], [1], [0, 0, 1, 1], [], []>} : vector<16x64xf32>, vector<64x8xf32>, vector<16x8xf32> -> vector<16x8xf32>
    %c0_9 = arith.constant 0 : index
    %c0_10 = arith.constant 0 : index
    %20 = vector.load %arg5[%c0_9, %c0_10] : memref<16x1xf32, #tpu.memory_space<vmem>>, vector<16x1xf32>
    %21 = vector.broadcast %20 : vector<16x1xf32> to vector<16x8xf32>
    %22 = arith.addf %19, %21 : vector<16x8xf32>
    %c0_11 = arith.constant 0 : index
    %c0_12 = arith.constant 0 : index
    %23 = vector.load %arg6[%c0_11, %c0_12] : memref<16x8xf32, #tpu.memory_space<vmem>>, vector<16x8xf32>
    tpu.vector_store %arg6[%c0_11, %c0_12], %22 {strides = array<i32>} : memref<16x8xf32, #tpu.memory_space<vmem>>, vector<16x8xf32>,
    return
  }
  func.func @transform_0(%arg0: i32) -> (i32, i32) {
    %c0_i32 = arith.constant 0 : i32
    %c0_i32_0 = arith.constant 0 : i32
    return %c0_i32, %arg0 : i32, i32
  }
  func.func @transform_1(%arg0: i32) -> (i32, i32) {
    %c0_i32 = arith.constant 0 : i32
    %c0_i32_0 = arith.constant 0 : i32
    %c0_i32_1 = arith.constant 0 : i32
    return %c0_i32, %c0_i32_0 : i32, i32
  }
  func.func @transform_2(%arg0: i32) -> (i32, i32) {
    %c0_i32 = arith.constant 0 : i32
    %c0_i32_0 = arith.constant 0 : i32
    %c0_i32_1 = arith.constant 0 : i32
    return %c0_i32, %c0_i32_0 : i32, i32
  }
  func.func @transform_3(%arg0: i32) -> (i32, i32) {
    %c0_i32 = arith.constant 0 : i32
    %c0_i32_0 = arith.constant 0 : i32
    %c0_i32_1 = arith.constant 0 : i32
    return %c0_i32, %c0_i32_0 : i32, i32
  }
  func.func @transform_4(%arg0: i32) -> (i32, i32) {
    %c0_i32 = arith.constant 0 : i32
    %c0_i32_0 = arith.constant 0 : i32
    %c0_i32_1 = arith.constant 0 : i32
    return %c0_i32, %c0_i32_0 : i32, i32
  }
  func.func @transform_5(%arg0: i32) -> (i32, i32) {
    %c0_i32 = arith.constant 0 : i32
    %c0_i32_0 = arith.constant 0 : i32
    return %c0_i32, %arg0 : i32, i32
  }
}

</mosaic_0001>

<bundles_post_ra>
// kernel: classifier_forward.1
= control target key start
LH: loop header
LB: loop body
LE: loop exit
PB: predicated region body
PF: predicated region fallthrough
CT: control target
= control target key end

     0   :  { %v361_v0 = vmov 0   ;;  %v362_v6 = vmov 1   ;;  %vm211_vm0 = vcmask 523264   ;;  %v117_v23 = vlaneseq  ;;  %s474_s2 = inlined_call_operand.vmem [shape: f32[64,1], index: 2, kind: input, shape index: {}]   ;;  %s475_s1 = inlined_call_operand.vmem [shape: f32[64,2], index: 1, kind: input, shape index: {}]   ;;  %s476_s3 = inlined_call_operand.vmem [shape: f32[16,64], index: 3, kind: input, shape index: {}]   ;;  %s477_s4 = inlined_call_operand.vmem [shape: f32[16,1], index: 4, kind: input, shape index: {}]   ;;  %s478_s0 = inlined_call_operand.vmem [shape: f32[2,8], index: 0, kind: input, shape index: {}]   ;;  %s479_s5 = inlined_call_operand.vmem [shape: f32[16,8], index: 5, kind: output, shape index: {}]  }
   0x1   :  { %350 = vset.pattern.permute.xlu1 %v361_v0  ;;  %349 = vset.pattern.permute.xlu0 %v361_v0  ;;  %v21_v1 = vld [vmem:[%s474_s2] sm:$0xff]  ;;  %v22_v3 = vld [vmem:[%s474_s2 + $0x8] sm:$0xff]  ;;  %v72_v5 = vld [vmem:[%s475_s1 + $0x18] sm:$0xff]  ;;  %vm293_vm1 = vcmask 64512  }
   0x2   :  { %v69_v2 = vld [vmem:[%s475_s1] sm:$0xff]  ;;  %31 = vperm.xlu1 %350, %v21_v1   ;;  %v70_v4 = vld [vmem:[%s475_s1 + $0x8] sm:$0xff]  ;;  %v71_v8 = vld [vmem:[%s475_s1 + $0x10] sm:$0xff]  ;;  %v118_v26 = vshrl.u32 %v117_v23, 7 }
   0x3   :  { %79 = vperm.xlu0 %349, %v69_v2   ;;  %v74_v7 = vld [vmem:[%s475_s1 + $0x28] sm:$0xff]  ;;  %v76_v9 = vld [vmem:[%s475_s1 + $0x38] sm:$0xff]  ;;  %v23_v10 = vld [vmem:[%s474_s2 + $0x10] sm:$0xff] }
   0x4   :  { %v24_v11 = vld [vmem:[%s474_s2 + $0x18] sm:$0xff]  ;;  %v73_v12 = vld [vmem:[%s475_s1 + $0x20] sm:$0xff]  ;;  %v75_v13 = vld [vmem:[%s475_s1 + $0x30] sm:$0xff]  ;;  %v119_v29 = vsub.s32 0, %v118_v26  ;;  %v171_v30 = vsub.s32 1, %v118_v26 }
   0x5   :  { %v25_v14 = vld [vmem:[%s474_s2 + $0x20] sm:$0xff]  ;;  %v26_v15 = vld [vmem:[%s474_s2 + $0x28] sm:$0xff]  ;;  %v27_v16 = vld [vmem:[%s474_s2 + $0x30] sm:$0xff] }
   0x6   :  { %36 = vperm.xlu1 %350, %v22_v3   ;;  %v28_v17 = vld [vmem:[%s474_s2 + $0x38] sm:$0xff]  ;;  %v197_v18 = vld [vmem:[%s476_s3] sm:$0xff]  ;;  %v200_v19 = vld [vmem:[%s477_s4 + $0x8] sm:$0xff] }
   0x7   :  { %84 = vperm.xlu0 %349, %v70_v4   ;;  %328 = vmatprep.mubr.msk.f32.mxu0 %vm211_vm0, %v197_v18  ;;  %v199_v20 = vld [vmem:[%s477_s4] sm:$0xff] }
   0x8   :  { %v20_v31 = vld [vmem:[%s478_s0] sm:$0x3] }
   0x9   :  { %v120_v33 = vrot.slane %v20_v31, %v119_v29  ;;  %v454_v34 = vrot.slane %v20_v31, %v171_v30 }
   0xa   :  { %351 = vset.pattern.permute.xlu1 %v362_v6 }
   0xb   :  { %94 = vperm.xlu0 %349, %v72_v5   ;;  %142 = vperm.xlu1 %351, %v70_v4  }
   0xf   :  { %104 = vperm.xlu0 %349, %v74_v7   ;;  %352 = vset.pattern.permute.xlu1 %v361_v0 }
  0x10   :  { %89 = vperm.xlu1 %352, %v71_v8  }
  0x13   :  { %114 = vperm.xlu0 %349, %v76_v9  }
  0x14   :  { %41 = vperm.xlu1 %352, %v23_v10  }
  0x17   :  { %357 = vset.pattern.permute.xlu0 %v362_v6 }
  0x18   :  { %138 = vperm.xlu0 %357, %v69_v2   ;;  %46 = vperm.xlu1 %352, %v24_v11  }
  0x1c   :  { %146 = vperm.xlu0 %357, %v71_v8   ;;  %353 = vset.pattern.permute.xlu1 %v362_v6 }
  0x1d   :  { %150 = vperm.xlu1 %353, %v72_v5  }
  0x20   :  { %154 = vperm.xlu0 %357, %v73_v12  }
  0x21   :  { %354 = vset.pattern.permute.xlu1 %v361_v0 }
  0x22   :  { %99 = vperm.xlu1 %354, %v73_v12  }
  0x24   :  { %162 = vperm.xlu0 %357, %v75_v13  }
  0x26   :  { %51 = vperm.xlu1 %354, %v25_v14  }
  0x28   :  { %360 = vset.pattern.permute.xlu0 %v361_v0 }
  0x29   :  { %208 = vperm.xlu0 %360, %v200_v19  }
  0x2a   :  { %56 = vperm.xlu1 %354, %v26_v15  }
  0x2e   :  { %355 = vset.pattern.permute.xlu1 %v362_v6 }
  0x2f   :  { %158 = vperm.xlu1 %355, %v74_v7  }
  0x33   :  { %356 = vset.pattern.permute.xlu1 %v361_v0 }
  0x34   :  { %109 = vperm.xlu1 %356, %v75_v13  }
  0x38   :  { %61 = vperm.xlu1 %356, %v27_v16  }
  0x3c   :  { %66 = vperm.xlu1 %356, %v28_v17  }
  0x40   :  { %358 = vset.pattern.permute.xlu1 %v362_v6 }
  0x41   :  { %166 = vperm.xlu1 %358, %v76_v9  }
  0x45   :  { %359 = vset.pattern.permute.xlu1 %v361_v0 }
  0x46   :  { %203 = vperm.xlu1 %359, %v199_v20  }
  0x81   :  { %v32_v21 = vpop.permute.xlu1 %31 }
  0x82   :  { %v80_v22 = vpop.permute.xlu0 %79 }
  0x83   :  { %v121_v38 = vmul.f32 %v120_v33, %v80_v22 }
  0x85   :  { %v37_v24 = vpop.permute.xlu1 %36  ;;  %v129_v43 = vadd.f32 %v121_v38, %v32_v21 }
  0x86   :  { %v85_v25 = vpop.permute.xlu0 %84 }
  0x87   :  { %v122_v36 = vmul.f32 %v120_v33, %v85_v25 }
  0x89   :  { %v130_v41 = vadd.f32 %v122_v36, %v37_v24 }
  0x8a   :  { %v95_v27 = vpop.permute.xlu0 %94  ;;  %v143_v28 = vpop.permute.xlu1 %142 }
  0x8b   :  { %v174_v39 = vmul.f32 %v454_v34, %v143_v28  ;;  %v124_v47 = vmul.f32 %v120_v33, %v95_v27 }
  0x8d   :  { %v182_v44 = vadd.f32 %v174_v39, %v130_v41 }
  0x8e   :  { %v105_v32 = vpop.permute.xlu0 %104 }
  0x8f   :  { %v90_v35 = vpop.permute.xlu1 %89  ;;  %v190_v51 = vmax.f32 %v182_v44, 0.0  ;;  %v126_v7 = vmul.f32 %v120_v33, %v105_v32  ;;  %v198_v32 = vld [vmem:[%s476_s3 + $0x8] sm:$0xff] }
  0x90   :  { %v123_v48 = vmul.f32 %v120_v33, %v90_v35 }
  0x92   :  { %v115_v37 = vpop.permute.xlu0 %114 }
  0x93   :  { %v42_v40 = vpop.permute.xlu1 %41  ;;  %v128_v22 = vmul.f32 %v120_v33, %v115_v37 }
  0x94   :  { %v131_v52 = vadd.f32 %v123_v48, %v42_v40 }
  0x97   :  { %v139_v42 = vpop.permute.xlu0 %138  ;;  %v47_v46 = vpop.permute.xlu1 %46 }
  0x98   :  { %v173_v45 = vmul.f32 %v454_v34, %v139_v42  ;;  %v132_v56 = vadd.f32 %v124_v47, %v47_v46 }
  0x9a   :  { %v181_v49 = vadd.f32 %v173_v45, %v129_v43 }
  0x9b   :  { %v147_v50 = vpop.permute.xlu0 %146 }
  0x9c   :  { %v189_v53 = vmax.f32 %v181_v49, 0.0  ;;  %v175_v54 = vmul.f32 %v454_v34, %v147_v50  ;;  %v151_v55 = vpop.permute.xlu1 %150 }
  0x9d   :  { %v176_v58 = vmul.f32 %v454_v34, %v151_v55 }
  0x9e   :  { %v183_v57 = vadd.f32 %v175_v54, %v131_v52  ;;  %v331_v59 = vpack.c.bf16 %v190_v51, %v189_v53 }
  0x9f   :  { %v184_v60 = vadd.f32 %v176_v58, %v132_v56  ;;  %v155_v2 = vpop.permute.xlu0 %154 }
  0xa0   :  { %332 = vmatprep.subr.bf16.mxu0 %v331_v59  ;;  %v191_v61 = vmax.f32 %v183_v57, 0.0  ;;  %v177_v6 = vmul.f32 %v454_v34, %v155_v2 }
  0xa1   :  { %334 = vmatpush3.bf16.msra.mxu0 %v331_v59  ;;  %v192_v62 = vmax.f32 %v184_v60, 0.0  ;;  %v100_v63 = vpop.permute.xlu1 %99 }
  0xa2   :  { %v125_v3 = vmul.f32 %v120_v33, %v100_v63 }
  0xa3   :  { %v335_v0 = vpack.c.bf16 %v192_v62, %v191_v61  ;;  %v163_v20 = vpop.permute.xlu0 %162 }
  0xa4   :  { %v179_v23 = vmul.f32 %v454_v34, %v163_v20 }
  0xa5   :  { %v52_v1 = vpop.permute.xlu1 %51  ;;  %336 = vmatprep.subr.bf16.mxu0 %v335_v0 }
  0xa6   :  { %338 = vmatpush3.bf16.msra.mxu0 %v335_v0  ;;  %v133_v5 = vadd.f32 %v125_v3, %v52_v1 }
  0xa8   :  { %v185_v9 = vadd.f32 %v177_v6, %v133_v5 }
  0xa9   :  { %v57_v4 = vpop.permute.xlu1 %56 }
  0xaa   :  { %v134_v10 = vadd.f32 %v126_v7, %v57_v4  ;;  %v193_v13 = vmax.f32 %v185_v9, 0.0 }
  0xae   :  { %v159_v8 = vpop.permute.xlu1 %158 }
  0xaf   :  { %v178_v11 = vmul.f32 %v454_v34, %v159_v8 }
  0xb1   :  { %v186_v12 = vadd.f32 %v178_v11, %v134_v10 }
  0xb3   :  { %v194_v14 = vmax.f32 %v186_v12, 0.0  ;;  %v110_v15 = vpop.permute.xlu1 %109 }
  0xb4   :  { %v127_v18 = vmul.f32 %v120_v33, %v110_v15  ;;  %v209_v33 = vpop.permute.xlu0 %208 }
  0xb5   :  { %v339_v16 = vpack.c.bf16 %v194_v14, %v193_v13 }
  0xb7   :  { %v62_v17 = vpop.permute.xlu1 %61  ;;  %340 = vmatprep.subr.bf16.mxu0 %v339_v16 }
  0xb8   :  { %342 = vmatpush3.bf16.msra.mxu0 %v339_v16  ;;  %v135_v21 = vadd.f32 %v127_v18, %v62_v17 }
  0xba   :  { %v187_v25 = vadd.f32 %v179_v23, %v135_v21 }
  0xbb   :  { %v67_v19 = vpop.permute.xlu1 %66 }
  0xbc   :  { %v136_v26 = vadd.f32 %v128_v22, %v67_v19  ;;  %v195_v29 = vmax.f32 %v187_v25, 0.0 }
  0xc0   :  { %v167_v24 = vpop.permute.xlu1 %166 }
  0xc1   :  { %v180_v27 = vmul.f32 %v454_v34, %v167_v24 }
  0xc3   :  { %v188_v28 = vadd.f32 %v180_v27, %v136_v26 }
  0xc5   :  { %v196_v30 = vmax.f32 %v188_v28, 0.0  ;;  %v204_v35 = vpop.permute.xlu1 %203 }
  0xc7   :  { %v343_v31 = vpack.c.bf16 %v196_v30, %v195_v29 }
  0xc9   :  { %344 = vmatprep.subr.bf16.mxu0 %v343_v31 }
  0xca   :  { %346 = vmatpush3.bf16.msra.mxu0 %v343_v31 }
  0xcd   :  { %329 = vmatmul.mubr.msk.f32.vlgmr.msra.gmra.mrb[0].mxu0 %vm211_vm0, %v198_v32 }
 0x1a0   :  { %v330_v36 = vpop.f32.mrb[0].mxu0 }
 0x1a1   :  { %v290_v37 = vadd.f32 %v330_v36, %v209_v33  ;;  %v284_v38 = vpop.f32.mrb[1].mxu0 }
 0x1a2   :  { %v285_v39 = vadd.f32 %v284_v38, %v204_v35 }
 0x1a3   :  { %295 = vst.msk [vmem:[%s479_s5 + $0x8] sm:$0xff] %vm293_vm1, %v290_v37 }
 0x1a4   :  { %294 = vst.msk [vmem:[%s479_s5] sm:$0xff] %vm293_vm1, %v285_v39 }

</bundles_post_ra>
